<compile_context>
chip_gen: v7x
topology: tpu7x:2x2x1
jax: 0.10.0
libtpu: 0.0.40
codegen_flags: <defaults>
</compile_context>

<pallas_src>
import functools

import jax
import jax.numpy as jnp
from jax.experimental import pallas as pl
from jax.experimental.pallas import tpu as pltpu


# ----------------------------------------------------------------------------
# Kernels
# ----------------------------------------------------------------------------

def _gct_fused_kernel(x_ref, o_ref, *, neg_half_c, eps, inv_hw):
    """Single-pass kernel. Block layout (BN, C, HW): spatial on lanes."""
    x = x_ref[...]                                                    # (BN, C, HW)
    # Global average pool over the spatial axis, accumulated in f32.
    y = jnp.sum(x, axis=-1, keepdims=True, dtype=jnp.float32) * inv_hw   # (BN, C, 1)
    # Cross-channel statistics (independent per batch row).
    mean = jnp.mean(y, axis=1, keepdims=True)                         # (BN, 1, 1)
    mean_x2 = jnp.mean(y * y, axis=1, keepdims=True)                  # (BN, 1, 1)
    # Clamp var at 0: guards against f32 cancellation NaNs (benign deviation).
    var = jnp.maximum(mean_x2 - mean * mean, 0.0)
    y_norm = (y - mean) * jax.lax.rsqrt(var + eps)                    # (BN, C, 1)
    gate = jnp.exp(y_norm * y_norm * neg_half_c)                      # (BN, C, 1)
    # Streaming multiply stays in the input dtype; only the tiny gate is cast.
    o_ref[...] = (x * gate.astype(x.dtype)).astype(o_ref.dtype)


def _gct_pool_kernel(x_ref, gate_ref, acc_ref, *, neg_half_c, eps, inv_hw):
    """Two-pass phase 1: accumulate the spatial sum over HW tiles; emit the
    tiny per-channel gate on the last HW step."""
    j = pl.program_id(1)

    @pl.when(j == 0)
    def _():
        acc_ref[...] = jnp.zeros_like(acc_ref)

    acc_ref[...] += jnp.sum(x_ref[...], axis=-1, keepdims=True, dtype=jnp.float32)

    @pl.when(j == pl.num_programs(1) - 1)
    def _():
        y = acc_ref[...] * inv_hw                                     # (BN, C, 1)
        mean = jnp.mean(y, axis=1, keepdims=True)
        mean_x2 = jnp.mean(y * y, axis=1, keepdims=True)
        var = jnp.maximum(mean_x2 - mean * mean, 0.0)
        y_norm = (y - mean) * jax.lax.rsqrt(var + eps)
        gate_ref[...] = jnp.exp(y_norm * y_norm * neg_half_c)


def _gct_scale_kernel(x_ref, gate_ref, o_ref):
    """Two-pass phase 2: broadcast-multiply the per-channel gate over HW tiles."""
    x = x_ref[...]
    o_ref[...] = (x * gate_ref[...].astype(x.dtype)).astype(o_ref.dtype)


# ----------------------------------------------------------------------------
# Chip-aware tuning helpers
# ----------------------------------------------------------------------------

def _chip_profile():
    """Generation-aware block / VMEM targets (defensive hardware queries)."""
    kind = ""
    try:
        kind = jax.devices()[0].device_kind.lower()
    except Exception:
        pass
    vmem_phys = None
    try:
        vmem_phys = int(pltpu.get_tpu_info().vmem_capacity_bytes)
    except Exception:
        vmem_phys = None

    is_v7 = ("v7" in kind) or (vmem_phys is not None and vmem_phys <= (64 << 20))
    is_v6 = ("v6" in kind) and not is_v7

    if is_v7:
        # 64 MiB physical VMEM, ~3.2 TB/s HBM, 2 TensorCores.
        return dict(target_block=10 << 20, vmem_cap=56 << 20,
                    min_grid=4, slab_threshold=12 << 20)
    if is_v6:
        # 128 MiB physical VMEM, ~1.4 TB/s HBM.
        return dict(target_block=20 << 20, vmem_cap=112 << 20,
                    min_grid=2, slab_threshold=28 << 20)
    # v5e / unknown: 4 MiB blocks already amortize the ~0.35 us step overhead.
    return dict(target_block=4 << 20, vmem_cap=64 << 20,
                min_grid=2, slab_threshold=28 << 20)


def _pick_bn(n, per_batch_bytes, target_bytes, min_grid):
    """Largest divisor of n whose block fits the target, preferring a grid of
    at least `min_grid` (then >= 2) steps so pipelining / both v7x TCs stay fed."""
    divisors = [d for d in range(1, n + 1) if n % d == 0]
    fitting = [d for d in divisors if d * per_batch_bytes <= target_bytes] or [1]
    for want in (min_grid, 2, 1):
        ok = [d for d in fitting if n // d >= want]
        if ok:
            return max(ok)
    return 1


def _pick_hw_tile(hw, ch, itemsize, target_bytes):
    """Largest multiple of 128 dividing hw with ch*tile*itemsize <= target,
    leaving at least two HW tiles so the pool pass actually pipelines."""
    best = 128
    tile = 128
    limit = hw // 2
    while tile <= limit:
        if hw % tile == 0 and ch * tile * itemsize <= target_bytes:
            best = tile
        tile += 128
    return best


# ----------------------------------------------------------------------------
# Wrapper
# ----------------------------------------------------------------------------

def _gct_single_pass(x2, prof, per_batch_bytes, itemsize, neg_half_c, eps, inv_hw):
    n, ch, hw = x2.shape
    bn = _pick_bn(n, per_batch_bytes, prof["target_block"], prof["min_grid"])
    grid = (n // bn,)
    block_shape = (bn, ch, hw)
    block_bytes = bn * per_batch_bytes

    # Double-buffered in + out blocks, one compute temp, plus headroom.
    vmem_limit = int(min(prof["vmem_cap"],
                         max(32 << 20, 5 * block_bytes + (4 << 20))))

    kernel = functools.partial(_gct_fused_kernel, neg_half_c=neg_half_c,
                               eps=float(eps), inv_hw=inv_hw)
    cost = pl.CostEstimate(flops=3 * x2.size,
                           transcendentals=2 * n * ch,
                           bytes_accessed=2 * x2.size * itemsize)

    return pl.pallas_call(
        kernel,
        out_shape=jax.ShapeDtypeStruct(x2.shape, x2.dtype),
        grid_spec=pltpu.PrefetchScalarGridSpec(
            num_scalar_prefetch=0,
            grid=grid,
            in_specs=[pl.BlockSpec(block_shape, lambda i: (i, 0, 0))],
            out_specs=pl.BlockSpec(block_shape, lambda i: (i, 0, 0)),
        ),
        compiler_params=pltpu.CompilerParams(
            dimension_semantics=("parallel",),
            vmem_limit_bytes=vmem_limit,
        ),
        cost_estimate=cost,
    )(x2)


def _gct_two_pass(x2, prof, itemsize, neg_half_c, eps, inv_hw):
    """Pool kernel (tiled over HW, emits per-channel gate) + rescale kernel."""
    n, ch, hw = x2.shape
    thw = _pick_hw_tile(hw, ch, itemsize, prof["target_block"])
    hw_tiles = hw // thw
    block_bytes = ch * thw * itemsize
    vmem_limit = int(min(prof["vmem_cap"],
                         max(32 << 20, 5 * block_bytes + (4 << 20))))

    # ---- phase 1: spatial pool + gate --------------------------------------
    pool_kernel = functools.partial(_gct_pool_kernel, neg_half_c=neg_half_c,
                                    eps=float(eps), inv_hw=inv_hw)
    pool_cost = pl.CostEstimate(flops=x2.size + 8 * n * ch,
                                transcendentals=2 * n * ch,
                                bytes_accessed=x2.size * itemsize + 4 * n * ch)
    gate = pl.pallas_call(
        pool_kernel,
        out_shape=jax.ShapeDtypeStruct((n, ch, 1), jnp.float32),
        grid_spec=pltpu.PrefetchScalarGridSpec(
            num_scalar_prefetch=0,
            grid=(n, hw_tiles),
            in_specs=[pl.BlockSpec((1, ch, thw), lambda i, j: (i, 0, j))],
            out_specs=pl.BlockSpec((1, ch, 1), lambda i, j: (i, 0, 0)),
            scratch_shapes=[pltpu.VMEM((1, ch, 1), jnp.float32)],
        ),
        compiler_params=pltpu.CompilerParams(
            dimension_semantics=("parallel", "arbitrary"),
            vmem_limit_bytes=vmem_limit,
        ),
        cost_estimate=pool_cost,
    )(x2)

    # ---- phase 2: rescale x by the per-channel gate -------------------------
    scale_cost = pl.CostEstimate(flops=x2.size,
                                 transcendentals=0,
                                 bytes_accessed=2 * x2.size * itemsize + 4 * n * ch)
    return pl.pallas_call(
        _gct_scale_kernel,
        out_shape=jax.ShapeDtypeStruct(x2.shape, x2.dtype),
        grid_spec=pltpu.PrefetchScalarGridSpec(
            num_scalar_prefetch=0,
            grid=(n, hw_tiles),
            in_specs=[pl.BlockSpec((1, ch, thw), lambda i, j: (i, 0, j)),
                      pl.BlockSpec((1, ch, 1), lambda i, j: (i, 0, 0))],
            out_specs=pl.BlockSpec((1, ch, thw), lambda i, j: (i, 0, j)),
        ),
        compiler_params=pltpu.CompilerParams(
            dimension_semantics=("parallel", "parallel"),
            vmem_limit_bytes=vmem_limit,
        ),
        cost_estimate=scale_cost,
    )(x2, gate)


def gct_forward(x, c=2, eps=1e-5, *, slab_threshold_bytes=None):
    """GCT forward. x: (N, C, H, W) float array. Returns same shape/dtype."""
    n, ch, h, w = x.shape
    hw = h * w
    itemsize = jnp.dtype(x.dtype).itemsize

    neg_half_c = -0.5 * float(c)
    inv_hw = 1.0 / float(hw)

    prof = _chip_profile()
    slab_threshold = (prof["slab_threshold"] if slab_threshold_bytes is None
                      else slab_threshold_bytes)

    # Native contiguous layout — no wrapper transposes (1 HBM read + 1 write).
    x2 = x.reshape(n, ch, hw)
    per_batch_bytes = ch * hw * itemsize

    two_pass = (per_batch_bytes > slab_threshold
                and hw % 128 == 0 and hw // 128 >= 2)

    if two_pass:
        out2 = _gct_two_pass(x2, prof, itemsize, neg_half_c, eps, inv_hw)
    else:
        out2 = _gct_single_pass(x2, prof, per_batch_bytes, itemsize,
                                neg_half_c, eps, inv_hw)
    return out2.reshape(n, ch, h, w)


# ----------------------------------------------------------------------------
# Pure-JAX reference (mirrors the PyTorch forward)
# ----------------------------------------------------------------------------

def gct_reference(x, c=2, eps=1e-5):
    y = jnp.mean(x, axis=(2, 3), keepdims=True)                       # (N, C, 1, 1)
    mean = jnp.mean(y, axis=1, keepdims=True)
    mean_x2 = jnp.mean(y ** 2, axis=1, keepdims=True)
    var = mean_x2 - mean ** 2
    y_norm = (y - mean) / jnp.sqrt(var + eps)
    y_transform = jnp.exp(-(y_norm ** 2 / 2.0 * c))
    return x * y_transform


if __name__ == "__main__":
    # 1) Base shape: lane-dense spatial-major path (HW = 256 >= 128).
    x = jax.random.normal(jax.random.PRNGKey(0), (2, 4, 16, 16), dtype=jnp.float32)
    out = jax.block_until_ready(gct_forward(x, c=2, eps=1e-5))
    ref = gct_reference(x, c=2, eps=1e-5)
    assert out.shape == x.shape and out.dtype == x.dtype
    assert jnp.allclose(out, ref, atol=1e-5, rtol=1e-5)

    # 2) Deep-layer shape (HW = 49 < 128): native layout, no wrapper transpose.
    x2 = jax.random.normal(jax.random.PRNGKey(1), (2, 128, 7, 7), dtype=jnp.float32)
    out2 = jax.block_until_ready(gct_forward(x2, c=2, eps=1e-5))
    assert jnp.allclose(out2, gct_reference(x2, c=2, eps=1e-5), atol=1e-5, rtol=1e-5)

    # 3) Exercise the two-pass (pool -> rescale) fallback at a small shape by
    #    forcing the slab threshold down (HW = 256 -> two 128-wide tiles).
    x3 = jax.random.normal(jax.random.PRNGKey(2), (2, 8, 16, 16), dtype=jnp.float32)
    out3 = jax.block_until_ready(
        gct_forward(x3, c=2, eps=1e-5, slab_threshold_bytes=1024))
    assert jnp.allclose(out3, gct_reference(x3, c=2, eps=1e-5), atol=1e-5, rtol=1e-5)

    print("KERNEL_OK")
</pallas_src>

<mosaic_0001>
module attributes {stable_mosaic.version = 11 : i64} {
  func.func @_gct_fused_kernel(%arg0: i32, %arg1: memref<1x4x256xf32, #tpu.memory_space<vmem>>, %arg2: memref<1x4x256xf32, #tpu.memory_space<vmem>>) attributes {dimension_semantics = [#tpu.dimension_semantics<parallel>], iteration_bounds = array<i64: 2>, scalar_prefetch = 0 : i64, scratch_operands = 0 : i64, tpu.core_type = #tpu.core_type<tc>, window_params = [{transform_indices = @transform_0, window_bounds = array<i64: 1, 4, 256>}, {transform_indices = @transform_1, window_bounds = array<i64: 1, 4, 256>}]} {
    %c0 = arith.constant 0 : index
    %c0_0 = arith.constant 0 : index
    %c0_1 = arith.constant 0 : index
    %0 = vector.load %arg1[%c0, %c0_0, %c0_1] : memref<1x4x256xf32, #tpu.memory_space<vmem>>, vector<1x4x256xf32>
    %cst = arith.constant dense<0.000000e+00> : vector<1x4xf32>
    %1 = vector.multi_reduction <add>, %0, %cst [2] : vector<1x4x256xf32> to vector<1x4xf32>
    %2 = vector.shape_cast %1 : vector<1x4xf32> to vector<1x4x1xf32>
    %cst_2 = arith.constant 3.906250e-03 : f32
    %3 = vector.broadcast %cst_2 : f32 to vector<1x4x1xf32>
    %4 = arith.mulf %2, %3 : vector<1x4x1xf32>
    %cst_3 = arith.constant dense<0.000000e+00> : vector<1x1xf32>
    %5 = vector.multi_reduction <add>, %4, %cst_3 [1] : vector<1x4x1xf32> to vector<1x1xf32>
    %6 = vector.shape_cast %5 : vector<1x1xf32> to vector<1x1x1xf32>
    %cst_4 = arith.constant 4.000000e+00 : f32
    %7 = vector.broadcast %cst_4 : f32 to vector<1x1x1xf32>
    %8 = arith.divf %6, %7 : vector<1x1x1xf32>
    %9 = arith.mulf %4, %4 : vector<1x4x1xf32>
    %cst_5 = arith.constant dense<0.000000e+00> : vector<1x1xf32>
    %10 = vector.multi_reduction <add>, %9, %cst_5 [1] : vector<1x4x1xf32> to vector<1x1xf32>
    %11 = vector.shape_cast %10 : vector<1x1xf32> to vector<1x1x1xf32>
    %cst_6 = arith.constant 4.000000e+00 : f32
    %12 = vector.broadcast %cst_6 : f32 to vector<1x1x1xf32>
    %13 = arith.divf %11, %12 : vector<1x1x1xf32>
    %14 = arith.mulf %8, %8 : vector<1x1x1xf32>
    %15 = arith.subf %13, %14 : vector<1x1x1xf32>
    %cst_7 = arith.constant 0.000000e+00 : f32
    %16 = vector.broadcast %cst_7 : f32 to vector<1x1x1xf32>
    %17 = arith.maximumf %15, %16 : vector<1x1x1xf32>
    %18 = vector.broadcast %8 : vector<1x1x1xf32> to vector<1x4x1xf32>
    %19 = arith.subf %4, %18 : vector<1x4x1xf32>
    %cst_8 = arith.constant 9.99999974E-6 : f32
    %20 = vector.broadcast %cst_8 : f32 to vector<1x1x1xf32>
    %21 = arith.addf %17, %20 : vector<1x1x1xf32>
    %22 = math.rsqrt %21 : vector<1x1x1xf32>
    %23 = vector.broadcast %22 : vector<1x1x1xf32> to vector<1x4x1xf32>
    %24 = arith.mulf %19, %23 : vector<1x4x1xf32>
    %25 = arith.mulf %24, %24 : vector<1x4x1xf32>
    %cst_9 = arith.constant -1.000000e+00 : f32
    %26 = vector.broadcast %cst_9 : f32 to vector<1x4x1xf32>
    %27 = arith.mulf %25, %26 : vector<1x4x1xf32>
    %28 = math.exp %27 : vector<1x4x1xf32>
    %29 = vector.broadcast %28 : vector<1x4x1xf32> to vector<1x4x256xf32>
    %30 = arith.mulf %0, %29 : vector<1x4x256xf32>
    %c0_10 = arith.constant 0 : index
    %c0_11 = arith.constant 0 : index
    %c0_12 = arith.constant 0 : index
    %31 = vector.load %arg2[%c0_10, %c0_11, %c0_12] : memref<1x4x256xf32, #tpu.memory_space<vmem>>, vector<1x4x256xf32>
    tpu.vector_store %arg2[%c0_10, %c0_11, %c0_12], %30 {strides = array<i32>} : memref<1x4x256xf32, #tpu.memory_space<vmem>>, vector<1x4x256xf32>,
    return
  }
  func.func @transform_0(%arg0: i32) -> (i32, i32, i32) {
    %c0_i32 = arith.constant 0 : i32
    %c0_i32_0 = arith.constant 0 : i32
    %c0_i32_1 = arith.constant 0 : i32
    return %arg0, %c0_i32, %c0_i32_0 : i32, i32, i32
  }
  func.func @transform_1(%arg0: i32) -> (i32, i32, i32) {
    %c0_i32 = arith.constant 0 : i32
    %c0_i32_0 = arith.constant 0 : i32
    %c0_i32_1 = arith.constant 0 : i32
    return %arg0, %c0_i32, %c0_i32_0 : i32, i32, i32
  }
}

</mosaic_0001>

<bundles_post_ra>
// kernel: tpu_custom_call.1
= control target key start
LH: loop header
LB: loop body
LE: loop exit
PB: predicated region body
PF: predicated region fallthrough
CT: control target
= control target key end

     0   :  { %6 = vsyncpa [#allocation3], 0  ;;  %s613_s0 = inlined_call_operand.hbm [shape: f32[2,4,256], index: 0, kind: input, shape index: {}]   ;;  %s614_s1 = inlined_call_operand.hbm [shape: f32[2,4,256], index: 1, kind: output, shape index: {}]  }
   0x1   :  { %8 = vsyncpa [#allocation3 + $0x1], 0 }
   0x2   :  { %9 = vsyncpa [#allocation4], 0 }
   0x3   :  { %11 = vsyncpa [#allocation4 + $0x1], 0  ;;  %s448_s6 = smov 0   ;;  %s450_s7 = smov 0  }
   0x4   :  { %s452_s8 = smov 0   ;;  %s454_s9 = smov 0  }
   0x5 LB: > { %s469_s10 = sadd.s32 4294967295, %s433_s9   ;;  %s269_s11 = sadd.s32 4294967294, %s433_s9   ;;  %s433_s9 = sphi %s454_s9, %s629_s9   ;;  %s429_s8 = sphi %s452_s8, %s628_s8   ;;  %s425_s7 = sphi %s450_s7, %s627_s7   ;;  %s421_s6 = sphi %s448_s6, %s626_s6  }
   0x6   : > { %s473_s12 = sadd.s32 1, %s433_s9   ;;  %s24_s13 = sadd.s32 1, %s429_s8 }
   0x7   : > { %s21_s14 = ssub.s32 %s433_s9, %s473_s12  ;;  %p31_p0 = scmp.ne.s32.totalorder %s429_s8, %s425_s7 }
   0x8   : > { %p22_p1 = scmp.eq.s32.totalorder %s21_s14, 0  ;;  %p32_p2 = scmp.eq.s32.totalorder %s433_s9, 0 }
   0x9   : > { %p37_p3 = scmp.ne.s32.totalorder %s425_s7, %s421_s6  ;;  %p38_p4 = scmp.eq.s32.totalorder %s469_s10, 0 }
   0xa   : > { %s485_s15 = scalar_select %p22_p1, %s429_s8, %s24_s13  }
   0xb   : > { %p487_p5 = por %p32_p2, %p31_p0  ;;  %p491_p6 = por %p38_p4, %p37_p3 }
   0xc   : > { %p61_p7 = scmp.eq.s32.totalorder %s469_s10, 1  ;;  %p67_p8 = scmp.eq.s32.totalorder %s269_s11, 1 }
   0xd   : > { %p297_p10 = scmp.lt.s32.totalorder %s433_s9, 2  ;;  %s87_s20 = sand.u32 1, %s429_s8  }
   0xe   : > { %p498_p11 = por %p61_p7, %p31_p0  ;;  %p502_p12 = por %p67_p8, %p37_p3 }
   0xf   : > { %s283_s21 = sshll.u32 %s433_s9, 7  ;;  %s272_s22 = sshll.u32 %s87_s20, 3 }
  0x10   : > { %s618_s18 = scalar_select %p498_p11, 1, 0 }
  0x11   : > { %s619_s19 = scalar_select %p502_p12, 1, 0 }
  0x12   : > { %s511_s25 = scalar_lea.hbm %s613_s0, %s283_s21  ;;  %s91_s26 = scalar_lea.vmem [#allocation2], %s272_s22 }
  0x13   : > { %s99_s27 = sshll.u32 %s91_s26, 4  ;;  %p515_p13 = pnand %p297_p10, %p487_p5  ;;  %s519_s27 = int_to_ptr.vmem [resolvable:$true] %s99_s27 }
  0x14   : > { %s88_s29 = scalar_lea.sflag [#allocation3], %s87_s20  ;;  %s337_s30 = scalar_lea.hbm %s511_s25, 128 }
  0x15   : > { %p338_p2 = scmp.ne.s32.totalorder %s511_s25, %s337_s30  ;;  %p339_p3 = pneg %p515_p13 }
  0x16   : > { %s342_s4 = scalar_lea.hbm %s613_s0, 256  ;;  %p343_p5 = scmp.lt.u32.totalorder %s511_s25, %s613_s0 }
  0x17   : > { %p340_p4 = pnand %p339_p3, %p338_p2  ;;  %p344_p8 = scmp.lt.u32.totalorder %s342_s4, %s337_s30 }
  0x18   : > { %p346_p9 = scmp.lt.u32.totalorder %s337_s30, %s511_s25 }
  0x19   : > { %p341_p7 = pneg %p340_p4  ;;  %p345_p10 = por %p344_p8, %p343_p5 }
  0x1b   : > { %p347_p0 = por %p346_p9, %p345_p10 }
  0x1d   : > { %p348_p1 = pnand %p347_p0, %p341_p7 }
  0x1f   : > { %351 = shalt.err (!%p348_p1)
}
  0x20   : > { %s352_s13 = scalar_lea.vmem %s519_s27, 128  ;;  %s435_s14 = smov [#allocation2]  }
  0x21   : > { %p353_p2 = scmp.ne.s32.totalorder %s519_s27, %s352_s13  ;;  %s357_s16 = sshll.u32 %s435_s14, 4  ;;  %s358_s16 = int_to_ptr.vmem [resolvable:$false] %s357_s16 }
  0x22   : > { %s359_s20 = scalar_lea.vmem %s358_s16, 256  ;;  %p360_p11 = scmp.lt.s32.totalorder %s519_s27, %s358_s16 }
  0x23   : > { %p355_p4 = pnand %p353_p2, %p339_p3  ;;  %p361_p5 = scmp.lt.s32.totalorder %s359_s20, %s352_s13 }
  0x25   : > { %p356_p12 = pneg %p355_p4  ;;  %p362_p8 = por %p361_p5, %p360_p11 }
  0x27   : > { %p363_p9 = pnand %p362_p8, %p356_p12 }
  0x29   : > { %366 = shalt.err (!%p363_p9)
}
  0x2a   : > { %292 = dma.hbm_to_vmem [thread:$0]  (!%p515_p13), %s511_s25, 128, %s519_s27, %s88_s29  }
  0x2b   : > { %p621_p0 = scmp.lt.s32.totalorder %s433_s9, 3  ;;  %p622_p1 = scmp.ge.s32.totalorder %s433_s9, 1 }
  0x2d   : > { %p105_p3 = pnand %p622_p1, %p621_p0 }
  0x2e   : > { %s553_s21 = sand.u32 (!%p105_p3), 1, %s425_s7  }
  0x2f   : > { %108 = sbr.rel (%p105_p3) target bundleno = 276 (0x114), region = 24  ;;  %s276_s22 = sshll.u32 (!%p105_p3), %s553_s21, 3 }
  0x30   : > { %s111_s23 = scalar_lea.sflag (!%p105_p3), [#allocation3], %s553_s21  ;;  %s114_s24 = scalar_lea.vmem (!%p105_p3), [#allocation2], %s276_s22 }
  0x36   : > { %412 = dma.done.wait (%p491_p6), %s111_s23, 128  }
  0x37   : > { %414 = vsyncadd (%p491_p6), %s111_s23, 4294967168  ;;  %vm137_vm0 = vcmask 1043456   ;;  %v133_v0 = vld [vmem:[%s114_s24] sm:$0xff]  ;;  %v436_v34 = vmov 839922192   ;;  %v177_v36 = vlaneseq  ;;  %s284_s17 = sshll.u32 %s469_s10, 7 }
  0x38   : > { %v135_v1 = vcombine.high %v133_v0, %v133_v0  ;;  %v138_v2 = vsel %vm137_vm0, %v133_v0, 0.0  ;;  %v175_v35 = vunpack.c.l.s4 %v436_v34  ;;  %s132_s25 = scalar_lea.vmem [#allocation5], %s276_s22  ;;  %s569_s29 = scalar_lea.hbm %s614_s1, %s284_s17 }
  0x39   : > { %v178_v38 = vshrl.u32 %v177_v36, 7  ;;  %s199_s26 = sshll.u32 %s132_s25, 4  ;;  %s185_s30 = scalar_lea.sflag [#allocation4], %s553_s21  ;;  %s571_s26 = int_to_ptr.vmem [resolvable:$true] %s199_s26 }
  0x3a   : > { %v139_v3 = vsel %vm137_vm0, %v135_v1, 0.0  ;;  %v176_v37 = vunpack.c.0.s8 %v175_v35  ;;  %s367_s2 = scalar_lea.vmem %s571_s26, 128  ;;  %p623_p11 = scmp.ne.s32.totalorder %s618_s18, 0 }
  0x3b   : > { %v140_v4 = vadd.f32 %v139_v3, %v138_v2  ;;  %p368_p6 = scmp.ne.s32.totalorder %s571_s26, %s367_s2  ;;  %s437_s10 = smov [#allocation5]  }
  0x3c   : > { %v179_v39 = vsub.s32 %v176_v37, %v178_v38  ;;  %s371_s3 = sshll.u32 %s437_s10, 4  ;;  %s372_s3 = int_to_ptr.vmem [resolvable:$false] %s371_s3 }
  0x3d   : > { %141 = vadd.xlane.f32.xlu0 %v140_v4  ;;  %p369_p12 = pnand %p368_p6, %p623_p11  ;;  %s373_s4 = scalar_lea.vmem %s372_s3, 256 }
  0x3e   : > { %p374_p7 = scmp.lt.s32.totalorder %s571_s26, %s372_s3  ;;  %p375_p10 = scmp.lt.s32.totalorder %s373_s4, %s367_s2 }
  0x3f   : > { %p370_p13 = pneg %p369_p12 }
  0x40   : > { %p376_p2 = por %p375_p10, %p374_p7 }
  0x42   : > { %p377_p4 = pnand %p376_p2, %p370_p13 }
  0xca   : > { %v142_v5 = vpop.xlane.xlu0 %141 }
  0xcb   : > { %v143_v6 = vmul.f32 0.00390625, %v142_v5 }
  0xcd   : > { %v144_v7 = vsel %vm137_vm0, %v143_v6, 0.0  ;;  %v153_v8 = vmul.f32 %v143_v6, %v143_v6 }
  0xce   : > { %v145_v9 = vrot.slane %v144_v7, 4 }
  0xcf   : > { %v154_v10 = vsel %vm137_vm0, %v153_v8, 0.0 }
  0xd0   : > { %v146_v11 = vadd.f32 %v145_v9, %v144_v7  ;;  %v155_v12 = vrot.slane %v154_v10, 4 }
  0xd2   : > { %v147_v13 = vrot.slane %v146_v11, 2  ;;  %v156_v14 = vadd.f32 %v155_v12, %v154_v10 }
  0xd4   : > { %v148_v15 = vadd.f32 %v147_v13, %v146_v11  ;;  %v157_v16 = vrot.slane %v156_v14, 2 }
  0xd6   : > { %v149_v17 = vrot.slane %v148_v15, 1  ;;  %v158_v18 = vadd.f32 %v157_v16, %v156_v14 }
  0xd8   : > { %v150_v19 = vadd.f32 %v149_v17, %v148_v15  ;;  %v159_v20 = vrot.slane %v158_v18, 1 }
  0xda   : > { %v152_v21 = vmul.f32 0.25, %v150_v19  ;;  %v160_v22 = vadd.f32 %v159_v20, %v158_v18 }
  0xdc   : > { %v161_v23 = vmul.f32 0.25, %v160_v22  ;;  %v162_v24 = vmul.f32 %v152_v21, %v152_v21  ;;  %v165_v28 = vsub.f32 %v143_v6, %v152_v21 }
  0xde   : > { %v163_v25 = vsub.f32 %v161_v23, %v162_v24 }
  0xe0   : > { %v164_v26 = vmax.f32 %v163_v25, 0.0 }
  0xe2   : > { %v166_v27 = vadd.f32 1e-05, %v164_v26 }
  0xe4   : > { %333 = vrsqrt.f32 %v166_v27 }
  0xee   : > { %v334_v29 = vpop.eup %333 }
  0xef   : > { %v168_v30 = vmul.f32 %v334_v29, %v165_v28 }
  0xf1   : > { %v169_v31 = vmul.f32 %v168_v30, %v168_v30 }
  0xf3   : > { %v170_v32 = vmul.f32 -1.0, %v169_v31 }
  0xf5   : > { %v171_v33 = vmul.f32 1.442695, %v170_v32 }
  0xf7   : > { %335 = vpow2.f32 %v171_v33 }
 0x101   : > { %v336_v40 = vpop.eup %335 }
 0x102   : > { %v180_v41 = vrot.slane %v336_v40, %v179_v39 }
 0x104   : > { %v182_v42 = vmul.f32 %v180_v41, %v133_v0 }
 0x106   : > { %183 = vst [vmem:[%s132_s25] sm:$0xff] %v182_v42 }
 0x107   : > { %380 = shalt.err (!%p377_p4)
}
 0x108   : > { %s381_s5 = scalar_lea.hbm %s569_s29, 128  ;;  %s385_s14 = scalar_lea.hbm %s614_s1, 256 }
 0x109   : > { %p382_p5 = scmp.ne.s32.totalorder %s569_s29, %s381_s5  ;;  %p386_p0 = scmp.lt.u32.totalorder %s569_s29, %s614_s1 }
 0x10a   : > { %p387_p1 = scmp.lt.u32.totalorder %s385_s14, %s381_s5  ;;  %p389_p6 = scmp.lt.u32.totalorder %s381_s5, %s569_s29 }
 0x10b   : > { %p383_p8 = pnand %p382_p5, %p623_p11 }
 0x10c   : > { %p388_p3 = por %p387_p1, %p386_p0 }
 0x10d   : > { %p384_p9 = pneg %p383_p8 }
 0x10e   : > { %p390_p12 = por %p389_p6, %p388_p3 }
 0x110   : > { %p391_p13 = pnand %p390_p12, %p384_p9 }
 0x112   : > { %394 = shalt.err (!%p391_p13)
}
 0x113   : > { %287 = dma.vmem_to_hbm [thread:$0]  (%p623_p11), %s571_s26, 128, %s569_s29, %s185_s30  }
 0x114 PF: > { %s211_s21 = sand.u32 1, %s421_s6   ;;  %p624_p7 = scmp.ne.s32.totalorder %s619_s19, 0 }
 0x115   : > { %p625_p10 = scmp.ge.s32.totalorder %s433_s9, 2  ;;  %s212_s22 = scalar_lea.sflag [#allocation4], %s211_s21 }
 0x117   : > { %p294_p2 = pnand %p625_p10, %p624_p7 }
 0x119   : > { %416 = dma.done.wait (!%p294_p2), %s212_s22, 128  }
 0x11a   : > { %418 = vsyncadd (!%p294_p2), %s212_s22, 4294967168  ;;  %p14_p4 = scmp.ge.s32.totalorder %s473_s12, 4   ;;  %s626_s6 = smov %s425_s7 }
 0x11b   : > { %s627_s7 = smov %s429_s8  ;;  %s628_s8 = smov %s485_s15 }
 0x11c   : > { %s629_s9 = smov %s473_s12  ;;  %16 = sbr.rel (!%p14_p4) target bundleno = 5 (0x5), region = 69 }
 0x123   :  { %217 = vsyncpa [#allocation3], 1 }
 0x124   :  { %219 = vsyncpa [#allocation3 + $0x1], 1 }
 0x125   :  { %220 = vsyncpa [#allocation4], 1 }
 0x126   :  { %222 = vsyncpa [#allocation4 + $0x1], 1 }

</bundles_post_ra>
